<compile_context>
chip_gen: v7x
topology: tpu7x:2x2x1
jax: 0.10.0
libtpu: 0.0.40
codegen_flags: <defaults>
</compile_context>

<pallas_src>
import jax
import jax.numpy as jnp
from jax import lax
from jax.experimental import pallas as pl
from jax.experimental.pallas import tpu as pltpu


def _round_up(v: int, m: int) -> int:
    return ((v + m - 1) // m) * m


def _reduce_block(x_ref, chunk: int):
    """Max over axis=1 of the (b_tile, n_tile, d_tile) block, chunked along sublanes."""
    n_tile = x_ref.shape[1]
    n_chunks = n_tile // chunk

    tile_max = jnp.max(x_ref[:, pl.ds(0, chunk), :], axis=1)
    if n_chunks == 1:
        return tile_max

    def body(i, acc):
        start = pl.multiple_of(i * chunk, chunk)
        return jnp.maximum(acc, jnp.max(x_ref[:, pl.ds(start, chunk), :], axis=1))

    return lax.fori_loop(1, n_chunks, body, tile_max, unroll=8)


def _maxpool_sets_kernel(x_ref, o_ref):
    # x_ref: (b_tile, n_tile, d_tile) VMEM, o_ref: (b_tile, d_tile) VMEM.
    n_tile = x_ref.shape[1]
    itemsize = jnp.dtype(x_ref.dtype).itemsize
    chunk = max(8, 32 // max(itemsize, 1))  # 8 sublanes for f32, 16 for bf16, 32 for i8
    if n_tile % chunk != 0:
        chunk = n_tile
    tile_max = _reduce_block(x_ref, chunk)

    n_id = pl.program_id(2)

    @pl.when(n_id == 0)
    def _init():
        o_ref[...] = tile_max

    @pl.when(n_id != 0)
    def _accumulate():
        o_ref[...] = jnp.maximum(o_ref[...], tile_max)


def maxpool_sets(x: jax.Array, *, b_tile: int = 8, n_tile: int = 512,
                 d_tile: int = 512) -> jax.Array:
    """Max over dim=1 of a (B, N, D) array, matching torch x.max(dim=1)[0]."""
    B, N, D = x.shape
    dtype = jnp.dtype(x.dtype)
    itemsize = dtype.itemsize

    # Sublane packing granularity: 8 for 32-bit, 16 for 16-bit, 32 for 8-bit.
    sub = max(8, 32 // max(itemsize, 1))

    # Clamp tiles to the (aligned) problem size, keep TPU tiling alignment.
    d_tile = _round_up(min(d_tile, _round_up(D, 128)), 128)
    n_tile = _round_up(min(n_tile, _round_up(N, sub)), sub)
    b_tile = _round_up(min(b_tile, _round_up(B, sub)), sub)

    Bp = _round_up(B, b_tile)
    Np = _round_up(N, n_tile)
    Dp = _round_up(D, d_tile)

    if (Bp, Np, Dp) != (B, N, D):
        # Pad with the identity of max so padded N rows never win.
        if jnp.issubdtype(dtype, jnp.floating):
            fill = jnp.array(-jnp.inf, dtype)
        else:
            fill = jnp.array(jnp.iinfo(dtype).min, dtype)
        x = jnp.pad(x, ((0, Bp - B), (0, Np - N), (0, Dp - D)),
                    constant_values=fill)

    grid = (Bp // b_tile, Dp // d_tile, Np // n_tile)

    block_in_bytes = b_tile * n_tile * d_tile * itemsize
    block_out_bytes = b_tile * d_tile * itemsize
    vmem_limit = max(32 * 1024 * 1024,
                     min(2 * block_in_bytes + 2 * block_out_bytes + (2 << 20),
                         96 * 1024 * 1024))

    out = pl.pallas_call(
        _maxpool_sets_kernel,
        out_shape=jax.ShapeDtypeStruct((Bp, Dp), dtype),
        grid_spec=pltpu.PrefetchScalarGridSpec(
            num_scalar_prefetch=0,
            grid=grid,
            in_specs=[
                pl.BlockSpec((b_tile, n_tile, d_tile), lambda b, d, n: (b, n, d)),
            ],
            out_specs=pl.BlockSpec((b_tile, d_tile), lambda b, d, n: (b, d)),
        ),
        compiler_params=pltpu.CompilerParams(
            dimension_semantics=("parallel", "parallel", "arbitrary"),
            vmem_limit_bytes=vmem_limit,
        ),
        cost_estimate=pl.CostEstimate(
            flops=int(Bp) * int(Np) * int(Dp),
            transcendentals=0,
            bytes_accessed=(int(Bp) * int(Np) * int(Dp) + int(Bp) * int(Dp)) * itemsize,
        ),
    )(x)

    return out[:B, :D]


if __name__ == "__main__":
    key = jax.random.PRNGKey(0)

    # 1) Small shape consistent with "a batch of sets of feature vectors".
    B, N, D = 2, 8, 256
    x = jax.random.normal(key, (B, N, D), dtype=jnp.float32)
    out = jax.block_until_ready(maxpool_sets(x))
    ref = jnp.max(x, axis=1)
    assert out.shape == (B, D)
    assert bool(jnp.array_equal(out, ref)), "Pallas result mismatch vs reference"

    # 2) Ragged shape exercising padding + the N-reduction (accumulator) path.
    key2 = jax.random.split(key, 2)[1]
    B2, N2, D2 = 3, 300, 384
    x2 = jax.random.normal(key2, (B2, N2, D2), dtype=jnp.float32)
    out2 = jax.block_until_ready(maxpool_sets(x2, b_tile=8, n_tile=128, d_tile=128))
    ref2 = jnp.max(x2, axis=1)
    assert out2.shape == (B2, D2)
    assert bool(jnp.array_equal(out2, ref2)), "Pallas result mismatch vs reference (tiled N)"

    print("KERNEL_OK")
</pallas_src>

<mosaic_0001>
module attributes {stable_mosaic.version = 11 : i64} {
  func.func @_maxpool_sets_kernel(%arg0: i32, %arg1: i32, %arg2: i32, %arg3: memref<8x8x256xf32, #tpu.memory_space<vmem>>, %arg4: memref<8x256xf32, #tpu.memory_space<vmem>>) attributes {dimension_semantics = [#tpu.dimension_semantics<parallel>, #tpu.dimension_semantics<parallel>, #tpu.dimension_semantics<arbitrary>], iteration_bounds = array<i64: 1, 1, 1>, scalar_prefetch = 0 : i64, scratch_operands = 0 : i64, tpu.core_type = #tpu.core_type<tc>, window_params = [{transform_indices = @transform_0, window_bounds = array<i64: 8, 8, 256>}, {transform_indices = @transform_1, window_bounds = array<i64: 8, 256>}]} {
    %c0 = arith.constant 0 : index
    %c0_0 = arith.constant 0 : index
    %c0_1 = arith.constant 0 : index
    %0 = vector.load %arg3[%c0, %c0_0, %c0_1] : memref<8x8x256xf32, #tpu.memory_space<vmem>>, vector<8x8x256xf32>
    %cst = arith.constant dense<0xFF800000> : vector<8x256xf32>
    %1 = vector.multi_reduction <maximumf>, %0, %cst [1] : vector<8x8x256xf32> to vector<8x256xf32>
    %c0_i32 = arith.constant 0 : i32
    %2 = arith.cmpi eq, %arg2, %c0_i32 : i32
    %3 = arith.extui %2 : i1 to i32
    %c0_i32_2 = arith.constant 0 : i32
    %4 = arith.cmpi ne, %3, %c0_i32_2 : i32
    scf.if %4 {
      %c0_5 = arith.constant 0 : index
      %c0_6 = arith.constant 0 : index
      %8 = vector.load %arg4[%c0_5, %c0_6] : memref<8x256xf32, #tpu.memory_space<vmem>>, vector<8x256xf32>
      tpu.vector_store %arg4[%c0_5, %c0_6], %1 {strides = array<i32>} : memref<8x256xf32, #tpu.memory_space<vmem>>, vector<8x256xf32>,
    } else {
    }
    %c0_i32_3 = arith.constant 0 : i32
    %5 = arith.cmpi ne, %arg2, %c0_i32_3 : i32
    %6 = arith.extui %5 : i1 to i32
    %c0_i32_4 = arith.constant 0 : i32
    %7 = arith.cmpi ne, %6, %c0_i32_4 : i32
    scf.if %7 {
      %c0_5 = arith.constant 0 : index
      %c0_6 = arith.constant 0 : index
      %8 = vector.load %arg4[%c0_5, %c0_6] : memref<8x256xf32, #tpu.memory_space<vmem>>, vector<8x256xf32>
      %9 = arith.maximumf %8, %1 : vector<8x256xf32>
      %c0_7 = arith.constant 0 : index
      %c0_8 = arith.constant 0 : index
      %10 = vector.load %arg4[%c0_7, %c0_8] : memref<8x256xf32, #tpu.memory_space<vmem>>, vector<8x256xf32>
      tpu.vector_store %arg4[%c0_7, %c0_8], %9 {strides = array<i32>} : memref<8x256xf32, #tpu.memory_space<vmem>>, vector<8x256xf32>,
    } else {
    }
    return
  }
  func.func @transform_0(%arg0: i32, %arg1: i32, %arg2: i32) -> (i32, i32, i32) {
    %c0_i32 = arith.constant 0 : i32
    return %arg0, %arg2, %arg1 : i32, i32, i32
  }
  func.func @transform_1(%arg0: i32, %arg1: i32, %arg2: i32) -> (i32, i32) {
    %c0_i32 = arith.constant 0 : i32
    return %arg0, %arg1 : i32, i32
  }
}

</mosaic_0001>

<bundles_post_ra>
// kernel: tpu_custom_call.1
= control target key start
LH: loop header
LB: loop body
LE: loop exit
PB: predicated region body
PF: predicated region fallthrough
CT: control target
= control target key end

     0   :  { %6 = vsyncpa [#allocation3], 0  ;;  %s348_s0 = inlined_call_operand.hbm [shape: f32[8,8,256], index: 0, kind: input, shape index: {}]   ;;  %s349_s1 = inlined_call_operand.hbm [shape: f32[8,256], index: 1, kind: output, shape index: {}]  }
   0x1   :  { %7 = vsyncpa [#allocation4], 0  ;;  %s296_s6 = smov [#allocation2]   ;;  %s248_s10 = scalar_lea.hbm %s348_s0, 2048 }
   0x2   :  { %s13_s7 = sshll.u32 %s296_s6, 4  ;;  %p249_p0 = scmp.ne.s32.totalorder %s348_s0, %s248_s10  ;;  %s14_s7 = int_to_ptr.vmem [resolvable:$true] %s13_s7 }
   0x3   :  { %p252_p1 = scmp.lt.u32.totalorder %s248_s10, %s348_s0 }
   0x5   :  { %p254_p2 = pnand %p252_p1, %p249_p0 }
   0x7   :  { %257 = shalt.err (!%p254_p2)
}
   0x8   :  { %s258_s15 = scalar_lea.vmem %s14_s7, 2048  ;;  %p263_p4 = scmp.lt.s32.totalorder %s14_s7, %s14_s7 }
   0x9   :  { %p259_p3 = scmp.ne.s32.totalorder %s14_s7, %s258_s15  ;;  %p264_p5 = scmp.lt.s32.totalorder %s258_s15, %s258_s15 }
   0xb   :  { %p265_p6 = por %p264_p5, %p263_p4 }
   0xd   :  { %p266_p7 = pnand %p265_p6, %p259_p3 }
   0xf   :  { %269 = shalt.err (!%p266_p7)
}
  0x10   :  { %s297_s16 = smov 256   ;;  %s298_s17 = smov 16  }
  0x11   :  { %19 = dma.hbm_to_vmem [thread:$0]  %s348_s0, 2048, %s14_s7, [#allocation3], %s297_s16, %s297_s16, %s298_s17  }
  0x12   :  { %292 = dma.done.wait [#allocation3], 2048  }
  0x13   :  { %293 = vsyncadd [#allocation3], 4294965248  ;;  %v23_v0 = vld [vmem:[#allocation2] sm:$0xff]  ;;  %v25_v1 = vld [vmem:[#allocation2 + $0x10] sm:$0xff]  ;;  %vm155_vm0 = vcmask 1041409   ;;  %vm157_vm1 = vcmask 1042434  }
  0x14   :  { %v27_v2 = vld [vmem:[#allocation2 + $0x20] sm:$0xff]  ;;  %v29_v3 = vld [vmem:[#allocation2 + $0x30] sm:$0xff]  ;;  %v39_v6 = vrot.slane %v23_v0, 4  ;;  %v51_v7 = vrot.slane %v25_v1, 4  ;;  %vm159_vm2 = vcmask 1043459   ;;  %vm161_vm3 = vcmask 1044484  }
  0x15   :  { %v31_v4 = vld [vmem:[#allocation2 + $0x40] sm:$0xff]  ;;  %v33_v5 = vld [vmem:[#allocation2 + $0x50] sm:$0xff]  ;;  %v63_v8 = vrot.slane %v27_v2, 4  ;;  %v75_v11 = vrot.slane %v29_v3, 4  ;;  %vm163_vm4 = vcmask 1045509   ;;  %vm165_vm5 = vcmask 1046534  }
  0x16   :  { %v35_v9 = vld [vmem:[#allocation2 + $0x60] sm:$0xff]  ;;  %v37_v10 = vld [vmem:[#allocation2 + $0x70] sm:$0xff]  ;;  %v87_v12 = vrot.slane %v31_v4, 4  ;;  %v99_v13 = vrot.slane %v33_v5, 4  ;;  %v40_v14 = vmax.f32 %v23_v0, %v39_v6  ;;  %v52_v15 = vmax.f32 %v25_v1, %v51_v7  ;;  %v24_v46 = vld [vmem:[#allocation2 + $0x8] sm:$0xff]  ;;  %s299_s0 = smov [#allocation5]  }
  0x17   :  { %v64_v16 = vmax.f32 %v27_v2, %v63_v8  ;;  %v111_v17 = vrot.slane %v35_v9, 4  ;;  %v76_v18 = vmax.f32 %v29_v3, %v75_v11  ;;  %v123_v21 = vrot.slane %v37_v10, 4  ;;  %v26_v47 = vld [vmem:[#allocation2 + $0x18] sm:$0xff]  ;;  %v28_v52 = vld [vmem:[#allocation2 + $0x28] sm:$0xff]  ;;  %s235_s20 = sshll.u32 %s299_s0, 4  ;;  %s236_s20 = int_to_ptr.vmem [resolvable:$true] %s235_s20 }
  0x18   :  { %v88_v19 = vmax.f32 %v31_v4, %v87_v12  ;;  %v100_v20 = vmax.f32 %v33_v5, %v99_v13  ;;  %v41_v22 = vrot.slane %v40_v14, 2  ;;  %v53_v23 = vrot.slane %v52_v15, 2  ;;  %v30_v53 = vld [vmem:[#allocation2 + $0x38] sm:$0xff]  ;;  %v32_v58 = vld [vmem:[#allocation2 + $0x48] sm:$0xff]  ;;  %s270_s21 = scalar_lea.vmem %s236_s20, 256  ;;  %p275_p9 = scmp.lt.s32.totalorder %s236_s20, %s236_s20 }
  0x19   :  { %v65_v24 = vrot.slane %v64_v16, 2  ;;  %v112_v25 = vmax.f32 %v35_v9, %v111_v17  ;;  %v77_v26 = vrot.slane %v76_v18, 2  ;;  %v124_v29 = vmax.f32 %v37_v10, %v123_v21  ;;  %v34_v61 = vld [vmem:[#allocation2 + $0x58] sm:$0xff]  ;;  %v36_v13 = vld [vmem:[#allocation2 + $0x68] sm:$0xff]  ;;  %p271_p8 = scmp.ne.s32.totalorder %s236_s20, %s270_s21  ;;  %p276_p10 = scmp.lt.s32.totalorder %s270_s21, %s270_s21 }
  0x1a   :  { %v89_v27 = vrot.slane %v88_v19, 2  ;;  %v101_v28 = vrot.slane %v100_v20, 2  ;;  %v42_v30 = vmax.f32 %v40_v14, %v41_v22  ;;  %v54_v31 = vmax.f32 %v52_v15, %v53_v23 }
  0x1b   :  { %v66_v32 = vmax.f32 %v64_v16, %v65_v24  ;;  %v113_v33 = vrot.slane %v112_v25, 2  ;;  %v78_v34 = vmax.f32 %v76_v18, %v77_v26  ;;  %v125_v37 = vrot.slane %v124_v29, 2  ;;  %v38_v18 = vld [vmem:[#allocation2 + $0x78] sm:$0xff]  ;;  %p277_p11 = por %p276_p10, %p275_p9 }
  0x1c   :  { %v90_v35 = vmax.f32 %v88_v19, %v89_v27  ;;  %v102_v36 = vmax.f32 %v100_v20, %v101_v28  ;;  %vm167_vm6 = vcmask 1047559   ;;  %v43_v38 = vrot.slane %v42_v30, 1 }
  0x1d   :  { %v55_v39 = vrot.slane %v54_v31, 1  ;;  %v67_v40 = vrot.slane %v66_v32, 1  ;;  %v114_v41 = vmax.f32 %v112_v25, %v113_v33  ;;  %v79_v42 = vrot.slane %v78_v34, 1  ;;  %p278_p12 = pnand %p277_p11, %p271_p8 }
  0x1e   :  { %v91_v43 = vrot.slane %v90_v35, 1  ;;  %v103_v44 = vrot.slane %v102_v36, 1  ;;  %v126_v45 = vmax.f32 %v124_v29, %v125_v37  ;;  %v44_v48 = vmax.f32 %v42_v30, %v43_v38 }
  0x1f   :  { %v56_v49 = vmax.f32 %v54_v31, %v55_v39  ;;  %v68_v50 = vmax.f32 %v66_v32, %v67_v40  ;;  %v115_v51 = vrot.slane %v114_v41, 1  ;;  %v80_v54 = vmax.f32 %v78_v34, %v79_v42 }
  0x20   :  { %v92_v55 = vmax.f32 %v90_v35, %v91_v43  ;;  %v104_v56 = vmax.f32 %v102_v36, %v103_v44  ;;  %v127_v57 = vrot.slane %v126_v45, 1  ;;  %v45_v62 = vrot.slane %v24_v46, 4 }
  0x21   :  { %v116_v59 = vmax.f32 %v114_v41, %v115_v51  ;;  %v156_v60 = vsel %vm155_vm0, %v56_v49, %v44_v48  ;;  %v57_v63 = vrot.slane %v26_v47, 4  ;;  %v69_v2 = vrot.slane %v28_v52, 4 }
  0x22   :  { %v128_v0 = vmax.f32 %v126_v45, %v127_v57  ;;  %v158_v1 = vsel %vm157_vm1, %v68_v50, %v156_v60  ;;  %v81_v3 = vrot.slane %v30_v53, 4  ;;  %v46_v5 = vmax.f32 %v24_v46, %v45_v62 }
  0x23   :  { %v160_v4 = vsel %vm159_vm2, %v80_v54, %v158_v1  ;;  %v58_v6 = vmax.f32 %v26_v47, %v57_v63  ;;  %v93_v7 = vrot.slane %v32_v58, 4  ;;  %v70_v9 = vmax.f32 %v28_v52, %v69_v2 }
  0x24   :  { %v162_v8 = vsel %vm161_vm3, %v92_v55, %v160_v4  ;;  %v82_v10 = vmax.f32 %v30_v53, %v81_v3  ;;  %v105_v11 = vrot.slane %v34_v61, 4  ;;  %v47_v14 = vrot.slane %v46_v5, 2 }
  0x25   :  { %v164_v12 = vsel %vm163_vm4, %v104_v56, %v162_v8  ;;  %v59_v15 = vrot.slane %v58_v6, 2  ;;  %v94_v16 = vmax.f32 %v32_v58, %v93_v7  ;;  %v71_v19 = vrot.slane %v70_v9, 2 }
  0x26   :  { %v166_v17 = vsel %vm165_vm5, %v116_v59, %v164_v12  ;;  %v83_v20 = vrot.slane %v82_v10, 2  ;;  %v106_v21 = vmax.f32 %v34_v61, %v105_v11  ;;  %v48_v23 = vmax.f32 %v46_v5, %v47_v14 }
  0x27   :  { %v168_v22 = vsel %vm167_vm6, %v128_v0, %v166_v17  ;;  %v60_v24 = vmax.f32 %v58_v6, %v59_v15  ;;  %v95_v25 = vrot.slane %v94_v16, 2  ;;  %v72_v26 = vmax.f32 %v70_v9, %v71_v19 }
  0x28   :  { %178 = vst [vmem:[#allocation5] sm:$0xff] %v168_v22  ;;  %v84_v27 = vmax.f32 %v82_v10, %v83_v20  ;;  %v107_v28 = vrot.slane %v106_v21, 2  ;;  %v117_v29 = vrot.slane %v36_v13, 4  ;;  %v49_v30 = vrot.slane %v48_v23, 1 }
  0x29   :  { %v61_v31 = vrot.slane %v60_v24, 1  ;;  %v96_v32 = vmax.f32 %v94_v16, %v95_v25  ;;  %v129_v33 = vrot.slane %v38_v18, 4  ;;  %v73_v34 = vrot.slane %v72_v26, 1 }
  0x2a   :  { %v85_v35 = vrot.slane %v84_v27, 1  ;;  %v108_v36 = vmax.f32 %v106_v21, %v107_v28  ;;  %v118_v37 = vmax.f32 %v36_v13, %v117_v29  ;;  %v50_v38 = vmax.f32 %v48_v23, %v49_v30 }
  0x2b   :  { %v62_v39 = vmax.f32 %v60_v24, %v61_v31  ;;  %v97_v40 = vrot.slane %v96_v32, 1  ;;  %v130_v41 = vmax.f32 %v38_v18, %v129_v33  ;;  %v74_v42 = vmax.f32 %v72_v26, %v73_v34 }
  0x2c   :  { %v86_v43 = vmax.f32 %v84_v27, %v85_v35  ;;  %v109_v44 = vrot.slane %v108_v36, 1  ;;  %v119_v45 = vrot.slane %v118_v37, 2 }
  0x2d   :  { %v98_v46 = vmax.f32 %v96_v32, %v97_v40  ;;  %v131_v47 = vrot.slane %v130_v41, 2  ;;  %v169_v48 = vsel %vm155_vm0, %v62_v39, %v50_v38 }
  0x2e   :  { %v110_v49 = vmax.f32 %v108_v36, %v109_v44  ;;  %v120_v50 = vmax.f32 %v118_v37, %v119_v45  ;;  %v170_v51 = vsel %vm157_vm1, %v74_v42, %v169_v48 }
  0x2f   :  { %v132_v52 = vmax.f32 %v130_v41, %v131_v47  ;;  %v171_v53 = vsel %vm159_vm2, %v86_v43, %v170_v51 }
  0x30   :  { %v121_v54 = vrot.slane %v120_v50, 1  ;;  %v172_v55 = vsel %vm161_vm3, %v98_v46, %v171_v53 }
  0x31   :  { %v133_v56 = vrot.slane %v132_v52, 1  ;;  %v173_v57 = vsel %vm163_vm4, %v110_v49, %v172_v55 }
  0x32   :  { %v122_v58 = vmax.f32 %v120_v50, %v121_v54 }
  0x33   :  { %v134_v59 = vmax.f32 %v132_v52, %v133_v56 }
  0x34   :  { %v174_v60 = vsel %vm165_vm5, %v122_v58, %v173_v57 }
  0x35   :  { %v175_v61 = vsel %vm167_vm6, %v134_v59, %v174_v60 }
  0x36   :  { %179 = vst [vmem:[#allocation5 + $0x8] sm:$0xff] %v175_v61 }
  0x37   :  { %281 = shalt.err (!%p278_p12)
}
  0x38   :  { %s282_s24 = scalar_lea.hbm %s349_s1, 256 }
  0x39   :  { %p283_p13 = scmp.ne.s32.totalorder %s349_s1, %s282_s24  ;;  %p286_p0 = scmp.lt.u32.totalorder %s282_s24, %s349_s1 }
  0x3b   :  { %p288_p1 = pnand %p286_p0, %p283_p13 }
  0x3d   :  { %291 = shalt.err (!%p288_p1)
}
  0x3e   :  { %238 = dma.vmem_to_hbm [thread:$0]  %s236_s20, 256, %s349_s1, [#allocation4]  }
  0x3f   :  { %294 = dma.done.wait [#allocation4], 256  }
  0x40   :  { %295 = vsyncadd [#allocation4], 4294967040 }
  0x41   :  { %242 = vsyncpa [#allocation3], 1 }
  0x42   :  { %243 = vsyncpa [#allocation4], 1 }

</bundles_post_ra>
